<compile_context>
chip_gen: v5e
topology: v5e:2x2
jax: 0.10.0
libtpu: 0.0.40
codegen_flags: <defaults>
</compile_context>

<pallas_src>
import jax
import jax.numpy as jnp
from jax.experimental import pallas as pl
from jax.experimental.pallas import tpu as pltpu


def _score_estimator_kernel(x_ref, mu_ref, mask_ref, bias1_ref,
                            w1x_ref, w1m_ref, w2_ref, b2_ref, o_ref):
    """One (batch, T-tile) step, NCT layout (frames on lanes).

    x_ref    : [C,  TT]  input tile
    mu_ref   : [C,  TT]  conditioning tile
    mask_ref : [1,  TT]  lane-dense mask
    bias1_ref: [H,  1]   per-batch  b1 + temb @ wt
    w1x_ref  : [H,  C]   w1x^T
    w1m_ref  : [H,  C]   w1m^T
    w2_ref   : [C,  H]   w2^T
    b2_ref   : [C,  1]
    o_ref    : [C,  TT]  lane-dense output
    """
    # Hidden projection: two small accumulating MXU dots (avoids an extra
    # HBM pass for a pre-concatenated [2C, T] tensor).
    h = jnp.dot(w1x_ref[...], x_ref[...],
                preferred_element_type=jnp.float32)              # [H, TT]
    h = h + jnp.dot(w1m_ref[...], mu_ref[...],
                    preferred_element_type=jnp.float32)          # [H, TT]
    h = jnp.tanh(h + bias1_ref[...])                             # EUP, lane-dense
    out = jnp.dot(w2_ref[...], h,
                  preferred_element_type=jnp.float32)            # [C, TT]
    out = (out + b2_ref[...]) * mask_ref[...]
    o_ref[...] = out.astype(o_ref.dtype)


def _time_embedding(t, dim):
    half = dim // 2
    freqs = jnp.exp(-jnp.log(10000.0)
                    * jnp.arange(half, dtype=jnp.float32) / (half - 1))
    ang = t.astype(jnp.float32)[:, None] * freqs[None, :]
    return jnp.concatenate([jnp.sin(ang), jnp.cos(ang)], axis=-1)   # [B, Ht]


def _pick_time_tile(T):
    """Largest lane tile (multiple of 128) dividing T, else full T."""
    for cand in (2048, 1024, 512, 256, 128):
        if T % cand == 0:
            return cand
    return T


def score_model_forward(x_nct, t, mu_nct, mask_n1t, params):
    """ScoreModel.forward: x_t = estimator(x, mask, mu, t, spk=None)."""
    B, C, T = x_nct.shape
    H = params["w1x"].shape[1]
    Ht = params["wt"].shape[0]

    t_tile = _pick_time_tile(T)
    n_t = T // t_tile

    # --- cheap wrapper-side setup (tiny vs the main tensors) ---
    temb = _time_embedding(t, Ht)                                   # [B, Ht]
    bias1 = (params["b1"] + temb @ params["wt"])[:, :, None]        # [B, H, 1]
    w1x_t = params["w1x"].T                                         # [H, C]
    w1m_t = params["w1m"].T                                         # [H, C]
    w2_t = params["w2"].T                                           # [C, H]
    b2 = params["b2"].T                                             # [C, 1]

    out = pl.pallas_call(
        _score_estimator_kernel,
        out_shape=jax.ShapeDtypeStruct((B, C, T), x_nct.dtype),
        grid_spec=pltpu.PrefetchScalarGridSpec(
            num_scalar_prefetch=0,
            grid=(B, n_t),
            in_specs=[
                pl.BlockSpec((pl.Squeezed(), C, t_tile),
                             lambda b, s: (b, 0, s)),               # x
                pl.BlockSpec((pl.Squeezed(), C, t_tile),
                             lambda b, s: (b, 0, s)),               # mu
                pl.BlockSpec((pl.Squeezed(), 1, t_tile),
                             lambda b, s: (b, 0, s)),               # mask
                pl.BlockSpec((pl.Squeezed(), H, 1),
                             lambda b, s: (b, 0, 0)),               # bias1
                pl.BlockSpec((H, C), lambda b, s: (0, 0)),          # w1x^T
                pl.BlockSpec((H, C), lambda b, s: (0, 0)),          # w1m^T
                pl.BlockSpec((C, H), lambda b, s: (0, 0)),          # w2^T
                pl.BlockSpec((C, 1), lambda b, s: (0, 0)),          # b2
            ],
            out_specs=pl.BlockSpec((pl.Squeezed(), C, t_tile),
                                   lambda b, s: (b, 0, s)),
        ),
        compiler_params=pltpu.CompilerParams(
            dimension_semantics=("parallel", "parallel")),
    )(x_nct, mu_nct, mask_n1t, bias1, w1x_t, w1m_t, w2_t, b2)

    return out                                                      # [B, C, T]


def _reference_forward(x_nct, t, mu_nct, mask_n1t, params):
    """Pure-JAX reference of the same synthetic estimator (original layout)."""
    x = jnp.transpose(x_nct, (0, 2, 1))
    mu = jnp.transpose(mu_nct, (0, 2, 1))
    mask = jnp.transpose(mask_n1t, (0, 2, 1))
    Ht = params["wt"].shape[0]
    temb = _time_embedding(t, Ht)                                   # [B, Ht]
    h = (x @ params["w1x"] + mu @ params["w1m"]
         + params["b1"][None] + (temb @ params["wt"])[:, None, :])
    h = jnp.tanh(h)
    out = (h @ params["w2"] + params["b2"][None]) * mask
    return jnp.transpose(out, (0, 2, 1))


if __name__ == "__main__":
    B, C, T = 2, 4, 1024    # batch, feature channels (n_feats), time frames
    H, Ht = 32, 32          # hidden width, time-embedding dim

    key = jax.random.PRNGKey(0)
    kx, kmu, kt, k1, k2, k3, k4, k5, k6 = jax.random.split(key, 9)

    # Inputs (PyTorch NCT convention).
    x = jax.random.normal(kx, (B, C, T), dtype=jnp.float32)
    mu = jax.random.normal(kmu, (B, C, T), dtype=jnp.float32)
    mask = jnp.concatenate(
        [jnp.ones((B, 1, T - 100), jnp.float32),
         jnp.zeros((B, 1, 100), jnp.float32)], axis=-1)             # [B, 1, T]
    t = jax.random.uniform(kt, (B,), dtype=jnp.float32)

    # Deterministic synthetic estimator parameters.
    params = {
        "w1x": 0.1 * jax.random.normal(k1, (C, H), jnp.float32),
        "w1m": 0.1 * jax.random.normal(k2, (C, H), jnp.float32),
        "b1":  0.1 * jax.random.normal(k3, (1, H), jnp.float32),
        "wt":  0.1 * jax.random.normal(k4, (Ht, H), jnp.float32),
        "w2":  0.1 * jax.random.normal(k5, (H, C), jnp.float32),
        "b2":  0.1 * jax.random.normal(k6, (1, C), jnp.float32),
    }

    out = score_model_forward(x, t, mu, mask, params)
    out = jax.block_until_ready(out)

    ref = _reference_forward(x, t, mu, mask, params)
    assert out.shape == (B, C, T)
    assert jnp.allclose(out, ref, atol=1e-4, rtol=1e-4), "mismatch vs reference"

    print("KERNEL_OK")
</pallas_src>

<mosaic_0001>
module attributes {stable_mosaic.version = 11 : i64} {
  func.func @_score_estimator_kernel(%arg0: i32, %arg1: i32, %arg2: memref<1x4x1024xf32, #tpu.memory_space<vmem>>, %arg3: memref<1x4x1024xf32, #tpu.memory_space<vmem>>, %arg4: memref<1x1x1024xf32, #tpu.memory_space<vmem>>, %arg5: memref<1x32x1xf32, #tpu.memory_space<vmem>>, %arg6: memref<32x4xf32, #tpu.memory_space<vmem>>, %arg7: memref<32x4xf32, #tpu.memory_space<vmem>>, %arg8: memref<4x32xf32, #tpu.memory_space<vmem>>, %arg9: memref<4x1xf32, #tpu.memory_space<vmem>>, %arg10: memref<1x4x1024xf32, #tpu.memory_space<vmem>>) attributes {dimension_semantics = [#tpu.dimension_semantics<parallel>, #tpu.dimension_semantics<parallel>], iteration_bounds = array<i64: 2, 1>, scalar_prefetch = 0 : i64, scratch_operands = 0 : i64, tpu.core_type = #tpu.core_type<tc>, window_params = [{transform_indices = @transform_0, window_bounds = array<i64: 1, 4, 1024>}, {transform_indices = @transform_1, window_bounds = array<i64: 1, 4, 1024>}, {transform_indices = @transform_2, window_bounds = array<i64: 1, 1, 1024>}, {transform_indices = @transform_3, window_bounds = array<i64: 1, 32, 1>}, {pipeline_mode = #tpu.pipeline_mode<synchronous>, transform_indices = @transform_4, window_bounds = array<i64: 32, 4>}, {pipeline_mode = #tpu.pipeline_mode<synchronous>, transform_indices = @transform_5, window_bounds = array<i64: 32, 4>}, {pipeline_mode = #tpu.pipeline_mode<synchronous>, transform_indices = @transform_6, window_bounds = array<i64: 4, 32>}, {pipeline_mode = #tpu.pipeline_mode<synchronous>, transform_indices = @transform_7, window_bounds = array<i64: 4, 1>}, {transform_indices = @transform_8, window_bounds = array<i64: 1, 4, 1024>}]} {
    %c0 = arith.constant 0 : index
    %c0_0 = arith.constant 0 : index
    %0 = vector.load %arg6[%c0, %c0_0] : memref<32x4xf32, #tpu.memory_space<vmem>>, vector<32x4xf32>
    %c0_1 = arith.constant 0 : index
    %c0_2 = arith.constant 0 : index
    %c0_3 = arith.constant 0 : index
    %1 = vector.load %arg2[%c0_1, %c0_2, %c0_3] : memref<1x4x1024xf32, #tpu.memory_space<vmem>>, vector<1x4x1024xf32>
    %2 = vector.shape_cast %1 : vector<1x4x1024xf32> to vector<4x1024xf32>
    %cst = arith.constant dense<0.000000e+00> : vector<32x1024xf32>
    %3 = tpu.matmul %0, %2, %cst {dimension_numbers = #tpu.dot_dimension_numbers<[1], [0], [0], [1], [0, 0, 1, 1], [], []>} : vector<32x4xf32>, vector<4x1024xf32>, vector<32x1024xf32> -> vector<32x1024xf32>
    %c0_4 = arith.constant 0 : index
    %c0_5 = arith.constant 0 : index
    %4 = vector.load %arg7[%c0_4, %c0_5] : memref<32x4xf32, #tpu.memory_space<vmem>>, vector<32x4xf32>
    %c0_6 = arith.constant 0 : index
    %c0_7 = arith.constant 0 : index
    %c0_8 = arith.constant 0 : index
    %5 = vector.load %arg3[%c0_6, %c0_7, %c0_8] : memref<1x4x1024xf32, #tpu.memory_space<vmem>>, vector<1x4x1024xf32>
    %6 = vector.shape_cast %5 : vector<1x4x1024xf32> to vector<4x1024xf32>
    %cst_9 = arith.constant dense<0.000000e+00> : vector<32x1024xf32>
    %7 = tpu.matmul %4, %6, %cst_9 {dimension_numbers = #tpu.dot_dimension_numbers<[1], [0], [0], [1], [0, 0, 1, 1], [], []>} : vector<32x4xf32>, vector<4x1024xf32>, vector<32x1024xf32> -> vector<32x1024xf32>
    %8 = arith.addf %3, %7 : vector<32x1024xf32>
    %c0_10 = arith.constant 0 : index
    %c0_11 = arith.constant 0 : index
    %c0_12 = arith.constant 0 : index
    %9 = vector.load %arg5[%c0_10, %c0_11, %c0_12] : memref<1x32x1xf32, #tpu.memory_space<vmem>>, vector<1x32x1xf32>
    %10 = vector.shape_cast %9 : vector<1x32x1xf32> to vector<32x1xf32>
    %11 = vector.broadcast %10 : vector<32x1xf32> to vector<32x1024xf32>
    %12 = arith.addf %8, %11 : vector<32x1024xf32>
    %13 = math.tanh %12 : vector<32x1024xf32>
    %c0_13 = arith.constant 0 : index
    %c0_14 = arith.constant 0 : index
    %14 = vector.load %arg8[%c0_13, %c0_14] : memref<4x32xf32, #tpu.memory_space<vmem>>, vector<4x32xf32>
    %cst_15 = arith.constant dense<0.000000e+00> : vector<4x1024xf32>
    %15 = tpu.matmul %14, %13, %cst_15 {dimension_numbers = #tpu.dot_dimension_numbers<[1], [0], [0], [1], [0, 0, 1, 1], [], []>} : vector<4x32xf32>, vector<32x1024xf32>, vector<4x1024xf32> -> vector<4x1024xf32>
    %c0_16 = arith.constant 0 : index
    %c0_17 = arith.constant 0 : index
    %16 = vector.load %arg9[%c0_16, %c0_17] : memref<4x1xf32, #tpu.memory_space<vmem>>, vector<4x1xf32>
    %17 = vector.broadcast %16 : vector<4x1xf32> to vector<4x1024xf32>
    %18 = arith.addf %15, %17 : vector<4x1024xf32>
    %c0_18 = arith.constant 0 : index
    %c0_19 = arith.constant 0 : index
    %c0_20 = arith.constant 0 : index
    %19 = vector.load %arg4[%c0_18, %c0_19, %c0_20] : memref<1x1x1024xf32, #tpu.memory_space<vmem>>, vector<1x1x1024xf32>
    %20 = vector.shape_cast %19 : vector<1x1x1024xf32> to vector<1x1024xf32>
    %21 = vector.broadcast %20 : vector<1x1024xf32> to vector<4x1024xf32>
    %22 = arith.mulf %18, %21 : vector<4x1024xf32>
    %c0_21 = arith.constant 0 : index
    %c0_22 = arith.constant 0 : index
    %c0_23 = arith.constant 0 : index
    %23 = vector.load %arg10[%c0_21, %c0_22, %c0_23] : memref<1x4x1024xf32, #tpu.memory_space<vmem>>, vector<1x4x1024xf32>
    %24 = vector.shape_cast %23 : vector<1x4x1024xf32> to vector<4x1024xf32>
    %25 = vector.shape_cast %22 : vector<4x1024xf32> to vector<1x4x1024xf32>
    tpu.vector_store %arg10[%c0_21, %c0_22, %c0_23], %25 {strides = array<i32>} : memref<1x4x1024xf32, #tpu.memory_space<vmem>>, vector<1x4x1024xf32>,
    return
  }
  func.func @transform_0(%arg0: i32, %arg1: i32) -> (i32, i32, i32) {
    %c0_i32 = arith.constant 0 : i32
    %c0_i32_0 = arith.constant 0 : i32
    return %arg0, %c0_i32, %arg1 : i32, i32, i32
  }
  func.func @transform_1(%arg0: i32, %arg1: i32) -> (i32, i32, i32) {
    %c0_i32 = arith.constant 0 : i32
    %c0_i32_0 = arith.constant 0 : i32
    return %arg0, %c0_i32, %arg1 : i32, i32, i32
  }
  func.func @transform_2(%arg0: i32, %arg1: i32) -> (i32, i32, i32) {
    %c0_i32 = arith.constant 0 : i32
    %c0_i32_0 = arith.constant 0 : i32
    return %arg0, %c0_i32, %arg1 : i32, i32, i32
  }
  func.func @transform_3(%arg0: i32, %arg1: i32) -> (i32, i32, i32) {
    %c0_i32 = arith.constant 0 : i32
    %c0_i32_0 = arith.constant 0 : i32
    %c0_i32_1 = arith.constant 0 : i32
    return %arg0, %c0_i32, %c0_i32_0 : i32, i32, i32
  }
  func.func @transform_4(%arg0: i32, %arg1: i32) -> (i32, i32) {
    %c0_i32 = arith.constant 0 : i32
    %c0_i32_0 = arith.constant 0 : i32
    %c0_i32_1 = arith.constant 0 : i32
    return %c0_i32, %c0_i32_0 : i32, i32
  }
  func.func @transform_5(%arg0: i32, %arg1: i32) -> (i32, i32) {
    %c0_i32 = arith.constant 0 : i32
    %c0_i32_0 = arith.constant 0 : i32
    %c0_i32_1 = arith.constant 0 : i32
    return %c0_i32, %c0_i32_0 : i32, i32
  }
  func.func @transform_6(%arg0: i32, %arg1: i32) -> (i32, i32) {
    %c0_i32 = arith.constant 0 : i32
    %c0_i32_0 = arith.constant 0 : i32
    %c0_i32_1 = arith.constant 0 : i32
    return %c0_i32, %c0_i32_0 : i32, i32
  }
  func.func @transform_7(%arg0: i32, %arg1: i32) -> (i32, i32) {
    %c0_i32 = arith.constant 0 : i32
    %c0_i32_0 = arith.constant 0 : i32
    %c0_i32_1 = arith.constant 0 : i32
    return %c0_i32, %c0_i32_0 : i32, i32
  }
  func.func @transform_8(%arg0: i32, %arg1: i32) -> (i32, i32, i32) {
    %c0_i32 = arith.constant 0 : i32
    %c0_i32_0 = arith.constant 0 : i32
    return %arg0, %c0_i32, %arg1 : i32, i32, i32
  }
}

</mosaic_0001>

<bundles_post_ra>
// kernel: tpu_custom_call.1
= control target key start
LH: loop header
LB: loop body
LE: loop exit
PB: predicated region body
PF: predicated region fallthrough
CT: control target
= control target key end

     0   :  { %13 = vsyncpa [#allocation3], 0  ;;  %s2269_s0 = inlined_call_operand.vmem [shape: f32[2,4,1024], index: 0, kind: input, shape index: {}]   ;;  %s2270_s1 = inlined_call_operand.vmem [shape: f32[2,4,1024], index: 1, kind: input, shape index: {}]   ;;  %s2271_s2 = inlined_call_operand.hbm [shape: f32[2,1,1024], index: 2, kind: input, shape index: {}]   ;;  %s2272_s3 = inlined_call_operand.vmem [shape: f32[2,32,1], index: 3, kind: input, shape index: {}]   ;;  %s2273_s4 = inlined_call_operand.vmem [shape: f32[32,4], index: 4, kind: input, shape index: {}]   ;;  %s2274_s5 = inlined_call_operand.vmem [shape: f32[32,4], index: 5, kind: input, shape index: {}]   ;;  %s2275_s6 = inlined_call_operand.vmem [shape: f32[4,32], index: 6, kind: input, shape index: {}]   ;;  %s2276_s7 = inlined_call_operand.vmem [shape: f32[4,1], index: 7, kind: input, shape index: {}]   ;;  %s2277_s8 = inlined_call_operand.hbm [shape: f32[2,4,1024], index: 8, kind: output, shape index: {}]  }
   0x1   :  { %15 = vsyncpa [#allocation3 + $0x1], 0 }
   0x2   :  { %16 = vsyncpa [#allocation4], 0 }
   0x3   :  { %18 = vsyncpa [#allocation4 + $0x1], 0  ;;  %s1872_s27 = smov 0   ;;  %s1874_s28 = smov 0  }
   0x4   :  { %s1876_s29 = smov 0   ;;  %s1878_s30 = smov 0  }
   0x5   :  { %s1880_s9 = smov 0   ;;  %s1882_s10 = smov 0  }
   0x6 LB: > { %s1470_s11 = sadd.s32 4294967295, %s1824_s10   ;;  %s1471_s12 = sadd.s32 4294967294, %s1824_s10   ;;  %s1824_s10 = sphi %s1882_s10, %s24_s10   ;;  %s1820_s9 = sphi %s1880_s9, %s2289_s9   ;;  %s1816_s30 = sphi %s1878_s30, %s2288_s30   ;;  %s1812_s29 = sphi %s1876_s29, %s2287_s29   ;;  %s1808_s28 = sphi %s1874_s28, %s2286_s28   ;;  %s1804_s27 = sphi %s1872_s27, %s2285_s27  }
   0x7   : > { %s36_s13 = sadd.s32 1, %s1820_s9  ;;  %s101_s14 = sadd.s32 1, %s1812_s29 }
   0x8   : > { %p38_p0 = scmp.ge.s32.totalorder %s36_s13, 2  ;;  %p108_p1 = scmp.ne.s32.totalorder %s1812_s29, %s1808_s28 }
   0x9   : > { %p109_p2 = scmp.eq.s32.totalorder %s1824_s10, 0  ;;  %p114_p3 = scmp.ne.s32.totalorder %s1808_s28, %s1804_s27 }
   0xa   : > { %s2291_s13 = smov (%p38_p0, %s36_s13), 0  ;;  %p115_p5 = scmp.eq.s32.totalorder %s1470_s11, 0 }
   0xb   : > { %2279 = sst [smem:[#allocation8_spill]] %s2291_s13  ;;  %p1913_p4 = por %p109_p2, %p108_p1 }
   0xc   : > { %s96_s16 = ssub.s32 %s1820_s9, %s2291_s13  ;;  %p250_p6 = scmp.eq.s32.totalorder %s1470_s11, 1 }
   0xd   : > { %p99_p7 = scmp.eq.s32.totalorder %s96_s16, 0  ;;  %p1919_p8 = por %p115_p5, %p114_p3 }
   0xe   : > { %p1923_p9 = por %p250_p6, %p108_p1  ;;  %p256_p10 = scmp.eq.s32.totalorder %s1471_s12, 1 }
   0xf   : > { %s1928_s19 = scalar_select %p99_p7, %s1812_s29, %s101_s14  }
  0x10   : > { %p1930_p11 = por %p256_p10, %p114_p3  ;;  %p1473_p12 = scmp.ge.s32.totalorder %s1824_s10, 2 }
  0x11   : > { %p1594_p13 = scmp.lt.s32.totalorder %s1824_s10, 2  ;;  %s314_s21 = sand.u32 1, %s1812_s29  }
  0x12   : > { %s1474_s22 = sshll.u32 %s314_s21, 3  ;;  %s1475_s23 = sshll.u32 %s1820_s9, 3 }
  0x13   : > { %s324_s26 = scalar_lea.hbm %s2271_s2, %s1475_s23  ;;  %s318_s11 = scalar_lea.vmem [#allocation2], %s1474_s22 }
  0x14   : > { %s328_s16 = sshll.u32 %s318_s11, 4  ;;  %s326_s13 = sshll.u32 %s324_s26, 4  ;;  %s329_s16 = int_to_ptr.vmem [resolvable:$true] %s328_s16  ;;  %s327_s13 = int_to_ptr.hbm [resolvable:$true] %s326_s13 }
  0x15   : > { %p1587_p0 = pnand %p1594_p13, %p1913_p4  ;;  %p1476_p1 = scmp.ge.s32.totalorder %s1824_s10, 1 }
  0x16   : > { %p341_p2 = scmp.lt.s32.totalorder %s1824_s10, 3  ;;  %s315_s12 = scalar_lea.sflag [#allocation3], %s314_s21 }
  0x17   : > { %1589 = dma.hbm_to_vmem [thread:$0]  (!%p1587_p0), %s327_s13, 128, %s329_s16, %s315_s12  }
  0x18   : > { %p342_p3 = pnand %p1476_p1, %p341_p2 }
  0x19   : > { %s1946_s14 = sand.u32 (!%p342_p3), 1, %s1808_s28  }
  0x1a   : > { %345 = sbr.rel (%p342_p3) target bundleno = 463 (0x1cf), region = 52  ;;  %s1477_s23 = sshll.u32 (!%p342_p3), %s1946_s14, 3 }
  0x1b   : > { %s348_s22 = scalar_lea.sflag (!%p342_p3), [#allocation3], %s1946_s14  ;;  %s1950_s24 = scalar_lea.vmem (!%p342_p3), [#allocation2], %s1477_s23 }
  0x1f   : > { %1795 = dma.done.wait (%p1919_p8), %s348_s22, 128  }
  0x20   : > { %1797 = vsyncadd (%p1919_p8), %s348_s22, 4294967168  ;;  %p409_p4 = scmp.lt.s32.totalorder %s1816_s30, 1  ;;  %vm483_vm0 = vcmask 1043456   ;;  %v443_v6 = vld [vmem:[%s2274_s5] sm:$0xff]  ;;  %vm470_vm1 = vcmask 31744   ;;  %v444_v17 = vld [vmem:[%s2274_s5 + $0x8] sm:$0xff] }
  0x21   : > { %v445_v22 = vld [vmem:[%s2274_s5 + $0x10] sm:$0xff]  ;;  %v446_v23 = vld [vmem:[%s2274_s5 + $0x18] sm:$0xff]  ;;  %v1826_v27 = vmov 0   ;;  %v435_v33 = vld [vmem:[%s2273_s4] sm:$0xff]  ;;  %vm1106_vm2 = vcmask 261120   ;;  %s1478_s23 = sshll.u32 %s1946_s14, 5 }
  0x22   : > { %s410_s13 = scalar_select %p409_p4, %s1816_s30, 1  ;;  %1646 = vset.pattern.permute.xlu1 %v1826_v27  ;;  %1645 = vset.pattern.permute.xlu0 %v1826_v27  ;;  %v436_v34 = vld [vmem:[%s2273_s4 + $0x8] sm:$0xff]  ;;  %v437_v35 = vld [vmem:[%s2273_s4 + $0x10] sm:$0xff]  ;;  %v438_v36 = vld [vmem:[%s2273_s4 + $0x18] sm:$0xff] }
  0x23   : > { %1647 = vset.pattern.permute.xlu2 %v1826_v27  ;;  %s2221_s22 = scalar_lea.vmem [#allocation5], %s1478_s23  ;;  %s1762_s23 = scalar_lea.hbm %s2277_s8, 64 }
  0x24   : > { %s1958_s15 = sshll.u32 %s410_s13, 5 }
  0x25   : > { %s426_s26 = scalar_lea.vmem %s2270_s1, %s1958_s15  ;;  %s416_s16 = scalar_lea.vmem %s2269_s0, %s1958_s15 }
  0x26   : > { %v447_v0 = vld [vmem:[%s426_s26] sm:$0xff]  ;;  %v448_v1 = vld [vmem:[%s426_s26 + $0x8] sm:$0xff]  ;;  %v450_v2 = vld [vmem:[%s426_s26 + $0x18] sm:$0xff]  ;;  %s2013_s12 = scalar_lea.vmem %s2272_s3, %s1958_s15 }
  0x27   : > { %455 = vst [vmem:[#allocation1] ss:$2 sm:$0xff] %v447_v0  ;;  %v449_v3 = vld [vmem:[%s426_s26 + $0x10] sm:$0xff]  ;;  %v439_v4 = vld [vmem:[%s416_s16] sm:$0xff]  ;;  %v440_v5 = vld [vmem:[%s416_s16 + $0x8] sm:$0xff]  ;;  %s1336_s26 = sshll.u32 %s2221_s22, 4  ;;  %s1337_s26 = int_to_ptr.vmem [resolvable:$true] %s1336_s26 }
  0x28   : > { %457 = vst [vmem:[#allocation1 + $0x10] ss:$2 sm:$0xff] %v448_v1  ;;  %v442_v10 = vld [vmem:[%s416_s16 + $0x18] sm:$0xff]  ;;  %v441_v14 = vld [vmem:[%s416_s16 + $0x10] sm:$0xff]  ;;  %v1012_v26 = vld [vmem:[%s2013_s12 + $0x8] sm:$0xff] }
  0x29   : > { %461 = vst [vmem:[#allocation1 + $0x30] ss:$2 sm:$0xff] %v450_v2  ;;  %1022 = vperm.xlu1 %1646, %v1012_v26   ;;  %v1011_v28 = vld [vmem:[%s2013_s12] sm:$0xff]  ;;  %v1014_v31 = vld [vmem:[%s2013_s12 + $0x18] sm:$0xff]  ;;  %v1013_v32 = vld [vmem:[%s2013_s12 + $0x10] sm:$0xff] }
  0x2a   : > { %459 = vst [vmem:[#allocation1 + $0x20] ss:$2 sm:$0xff] %v449_v3  ;;  %1032 = vperm.xlu0 %1645, %v1014_v31  }
  0x2e   : > { %v462_v7 = vld.sshfl [vmem:[#allocation1] sm:$0xff pattern:$0x75316420]  ;;  %v463_v8 = vld.sshfl [vmem:[#allocation1 + $0x8] sm:$0xff pattern:$0x75316420] }
  0x2f   : > { %1485 = vmatpush.msk.msra.mxu0 %vm483_vm0, %v462_v7  ;;  %1490 = vmatpush.msk.msra.mxu1 %vm483_vm0, %v463_v8  ;;  %736 = vst [vmem:[#allocation1] ss:$2 sm:$0xff] %v439_v4  ;;  %v464_v9 = vld.sshfl [vmem:[#allocation1 + $0x10] sm:$0xff pattern:$0x75316420] }
  0x30   : > { %1495 = vmatpush.msk.msra.mxu2 %vm483_vm0, %v464_v9  ;;  %v465_v11 = vld.sshfl [vmem:[#allocation1 + $0x18] sm:$0xff pattern:$0x75316420]  ;;  %1486 = vmatmul.msk.f32.vlgmr.msra.gmra.mxu0 %vm470_vm1, %v443_v6  ;;  %v468_v13 = vld.sshfl [vmem:[#allocation1 + $0x30] sm:$0xff pattern:$0x75316420] }
  0x31   : > { %v469_v12 = vld.sshfl [vmem:[#allocation1 + $0x38] sm:$0xff pattern:$0x75316420]  ;;  %1500 = vmatpush.msk.msra.mxu3 %vm483_vm0, %v465_v11  ;;  %738 = vst [vmem:[#allocation1 + $0x10] ss:$2 sm:$0xff] %v440_v5  ;;  %1491 = vmatmul.msk.f32.vlgmr.msra.gmra.mxu1 %vm470_vm1, %v443_v6 }
  0x32   : > { %1496 = vmatmul.msk.f32.vlgmr.msra.gmra.mxu2 %vm470_vm1, %v443_v6  ;;  %1501 = vmatmul.msk.f32.vlgmr.msra.gmra.mxu3 %vm470_vm1, %v443_v6  ;;  %742 = vst [vmem:[#allocation1 + $0x30] ss:$2 sm:$0xff] %v442_v10  ;;  %v467_v15 = vld.sshfl [vmem:[#allocation1 + $0x28] sm:$0xff pattern:$0x75316420] }
  0x33   : > { %1520 = vmatpush.msk.msrb.mxu3 %vm483_vm0, %v469_v12  ;;  %1515 = vmatpush.msk.msrb.mxu2 %vm483_vm0, %v468_v13  ;;  %v466_v16 = vld.sshfl [vmem:[#allocation1 + $0x20] sm:$0xff pattern:$0x75316420] }
  0x34   : > { %1510 = vmatpush.msk.msrb.mxu1 %vm483_vm0, %v467_v15  ;;  %1505 = vmatpush.msk.msrb.mxu0 %vm483_vm0, %v466_v16  ;;  %740 = vst [vmem:[#allocation1 + $0x20] ss:$2 sm:$0xff] %v441_v14 }
  0x35   : > { %1017 = vperm.xlu1 %1646, %v1011_v28   ;;  %1027 = vperm.xlu0 %1645, %v1013_v32  }
  0x36   : > { %v744_v20 = vld.sshfl [vmem:[#allocation1 + $0x8] sm:$0xff pattern:$0x75316420]  ;;  %v743_v21 = vld.sshfl [vmem:[#allocation1] sm:$0xff pattern:$0x75316420] }
  0x37   : > { %1530 = vmatpush.msk.msra.mxu1 %vm483_vm0, %v744_v20  ;;  %1525 = vmatpush.msk.msra.mxu0 %vm483_vm0, %v743_v21 }
  0x38   : > { %1487 = vmatmul.msk.f32.gmra.mxu0 %vm470_vm1, %v444_v17  ;;  %v746_v18 = vld.sshfl [vmem:[#allocation1 + $0x18] sm:$0xff pattern:$0x75316420]  ;;  %v745_v19 = vld.sshfl [vmem:[#allocation1 + $0x10] sm:$0xff pattern:$0x75316420] }
  0x39   : > { %1492 = vmatmul.msk.f32.gmra.mxu1 %vm470_vm1, %v444_v17  ;;  %1540 = vmatpush.msk.msra.mxu3 %vm483_vm0, %v746_v18  ;;  %v750_v24 = vld.sshfl [vmem:[#allocation1 + $0x38] sm:$0xff pattern:$0x75316420]  ;;  %v749_v25 = vld.sshfl [vmem:[#allocation1 + $0x30] sm:$0xff pattern:$0x75316420] }
  0x3a   : > { %1497 = vmatmul.msk.f32.gmra.mxu2 %vm470_vm1, %v444_v17  ;;  %1502 = vmatmul.msk.f32.gmra.mxu3 %vm470_vm1, %v444_v17 }
  0x3b   : > { %1535 = vmatpush.msk.msra.mxu2 %vm483_vm0, %v745_v19  ;;  %v748_v29 = vld.sshfl [vmem:[#allocation1 + $0x28] sm:$0xff pattern:$0x75316420]  ;;  %v747_v30 = vld.sshfl [vmem:[#allocation1 + $0x20] sm:$0xff pattern:$0x75316420] }
  0x40   : > { %1488 = vmatmul.msk.f32.gmra.mxu0 %vm470_vm1, %v445_v22 }
  0x41   : > { %1493 = vmatmul.msk.f32.gmra.mxu1 %vm470_vm1, %v445_v22 }
  0x42   : > { %1498 = vmatmul.msk.f32.gmra.mxu2 %vm470_vm1, %v445_v22  ;;  %1503 = vmatmul.msk.f32.gmra.mxu3 %vm470_vm1, %v445_v22 }
  0x48   : > { %1489 = vmatmul.msk.f32.gmra.mxu0 %vm470_vm1, %v446_v23 }
  0x49   : > { %1494 = vmatmul.msk.f32.gmra.mxu1 %vm470_vm1, %v446_v23 }
  0x4a   : > { %1499 = vmatmul.msk.f32.gmra.mxu2 %vm470_vm1, %v446_v23  ;;  %1504 = vmatmul.msk.f32.gmra.mxu3 %vm470_vm1, %v446_v23 }
  0x50   : > { %1506 = vmatmul.msk.f32.vlgmr.msrb.gmra.mxu0 %vm470_vm1, %v443_v6 }
  0x51   : > { %1511 = vmatmul.msk.f32.vlgmr.msrb.gmra.mxu1 %vm470_vm1, %v443_v6  ;;  %1545 = vmatpush.msk.msrb.mxu0 %vm483_vm0, %v747_v30 }
  0x52   : > { %1516 = vmatmul.msk.f32.vlgmr.msrb.gmra.mxu2 %vm470_vm1, %v443_v6  ;;  %1521 = vmatmul.msk.f32.vlgmr.msrb.gmra.mxu3 %vm470_vm1, %v443_v6 }
  0x53   : > { %1560 = vmatpush.msk.msrb.mxu3 %vm483_vm0, %v750_v24  ;;  %1555 = vmatpush.msk.msrb.mxu2 %vm483_vm0, %v749_v25 }
  0x54   : > { %1550 = vmatpush.msk.msrb.mxu1 %vm483_vm0, %v748_v29 }
  0x58   : > { %1507 = vmatmul.msk.f32.gmra.mxu0 %vm470_vm1, %v444_v17 }
  0x59   : > { %1512 = vmatmul.msk.f32.gmra.mxu1 %vm470_vm1, %v444_v17 }
  0x5a   : > { %1517 = vmatmul.msk.f32.gmra.mxu2 %vm470_vm1, %v444_v17  ;;  %1522 = vmatmul.msk.f32.gmra.mxu3 %vm470_vm1, %v444_v17 }
  0x60   : > { %1508 = vmatmul.msk.f32.gmra.mxu0 %vm470_vm1, %v445_v22 }
  0x61   : > { %1513 = vmatmul.msk.f32.gmra.mxu1 %vm470_vm1, %v445_v22 }
  0x62   : > { %1518 = vmatmul.msk.f32.gmra.mxu2 %vm470_vm1, %v445_v22  ;;  %1523 = vmatmul.msk.f32.gmra.mxu3 %vm470_vm1, %v445_v22 }
  0x68   : > { %1509 = vmatmul.msk.f32.gmra.mxu0 %vm470_vm1, %v446_v23 }
  0x69   : > { %1514 = vmatmul.msk.f32.gmra.mxu1 %vm470_vm1, %v446_v23 }
  0x6a   : > { %1519 = vmatmul.msk.f32.gmra.mxu2 %vm470_vm1, %v446_v23  ;;  %1524 = vmatmul.msk.f32.gmra.mxu3 %vm470_vm1, %v446_v23 }
  0x70   : > { %1526 = vmatmul.msk.f32.vlgmr.msra.gmra.mxu0 %vm470_vm1, %v435_v33 }
  0x71   : > { %1531 = vmatmul.msk.f32.vlgmr.msra.gmra.mxu1 %vm470_vm1, %v435_v33 }
  0x72   : > { %1536 = vmatmul.msk.f32.vlgmr.msra.gmra.mxu2 %vm470_vm1, %v435_v33  ;;  %1541 = vmatmul.msk.f32.vlgmr.msra.gmra.mxu3 %vm470_vm1, %v435_v33 }
  0x78   : > { %1527 = vmatmul.msk.f32.gmra.mxu0 %vm470_vm1, %v436_v34 }
  0x79   : > { %1532 = vmatmul.msk.f32.gmra.mxu1 %vm470_vm1, %v436_v34 }
  0x7a   : > { %1537 = vmatmul.msk.f32.gmra.mxu2 %vm470_vm1, %v436_v34  ;;  %1542 = vmatmul.msk.f32.gmra.mxu3 %vm470_vm1, %v436_v34 }
  0x80   : > { %1528 = vmatmul.msk.f32.gmra.mxu0 %vm470_vm1, %v437_v35 }
  0x81   : > { %1533 = vmatmul.msk.f32.gmra.mxu1 %vm470_vm1, %v437_v35 }
  0x82   : > { %1538 = vmatmul.msk.f32.gmra.mxu2 %vm470_vm1, %v437_v35  ;;  %1543 = vmatmul.msk.f32.gmra.mxu3 %vm470_vm1, %v437_v35 }
  0x88   : > { %1529 = vmatmul.msk.f32.gmra.mxu0 %vm470_vm1, %v438_v36 }
  0x89   : > { %1534 = vmatmul.msk.f32.gmra.mxu1 %vm470_vm1, %v438_v36 }
  0x8a   : > { %1539 = vmatmul.msk.f32.gmra.mxu2 %vm470_vm1, %v438_v36  ;;  %1544 = vmatmul.msk.f32.gmra.mxu3 %vm470_vm1, %v438_v36 }
  0x90   : > { %1546 = vmatmul.msk.f32.vlgmr.msrb.gmra.mxu0 %vm470_vm1, %v435_v33 }
  0x91   : > { %1551 = vmatmul.msk.f32.vlgmr.msrb.gmra.mxu1 %vm470_vm1, %v435_v33 }
  0x92   : > { %1556 = vmatmul.msk.f32.vlgmr.msrb.gmra.mxu2 %vm470_vm1, %v435_v33  ;;  %1561 = vmatmul.msk.f32.vlgmr.msrb.gmra.mxu3 %vm470_vm1, %v435_v33 }
  0x98   : > { %1547 = vmatmul.msk.f32.gmra.mxu0 %vm470_vm1, %v436_v34 }
  0x99   : > { %1552 = vmatmul.msk.f32.gmra.mxu1 %vm470_vm1, %v436_v34 }
  0x9a   : > { %1557 = vmatmul.msk.f32.gmra.mxu2 %vm470_vm1, %v436_v34  ;;  %1562 = vmatmul.msk.f32.gmra.mxu3 %vm470_vm1, %v436_v34 }
  0x9b   : > { %v2122_v11 = vpop.permute.xlu1 %1022 }
  0x9c   : > { %v2124_v12 = vpop.permute.xlu0 %1032 }
  0xa0   : > { %1548 = vmatmul.msk.f32.gmra.mxu0 %vm470_vm1, %v437_v35 }
  0xa1   : > { %1553 = vmatmul.msk.f32.gmra.mxu1 %vm470_vm1, %v437_v35 }
  0xa2   : > { %1558 = vmatmul.msk.f32.gmra.mxu2 %vm470_vm1, %v437_v35  ;;  %1563 = vmatmul.msk.f32.gmra.mxu3 %vm470_vm1, %v437_v35 }
  0xa7   : > { %v2126_v19 = vpop.permute.xlu1 %1017  ;;  %v2130_v28 = vpop.permute.xlu0 %1027 }
  0xa8   : > { %1549 = vmatmul.msk.f32.gmra.mxu0 %vm470_vm1, %v438_v36 }
  0xa9   : > { %1554 = vmatmul.msk.f32.gmra.mxu1 %vm470_vm1, %v438_v36 }
  0xaa   : > { %1559 = vmatmul.msk.f32.gmra.mxu2 %vm470_vm1, %v438_v36  ;;  %1564 = vmatmul.msk.f32.gmra.mxu3 %vm470_vm1, %v438_v36 }
  0xad   : > { %v517_v37 = vpop.f32.mrf.mxu0 }
  0xae   : > { %v546_v38 = vpop.f32.mrf.mxu1 }
  0xb5   : > { %v2082_v39 = vpop.f32.mrf.mxu2  ;;  %v2084_v40 = vpop.f32.mrf.mxu3 }
  0xb6   : > { %v520_v41 = vpop.f32.mrf.mxu0  ;;  %v549_v42 = vpop.f32.mrf.mxu1 }
  0xbd   : > { %v2086_v43 = vpop.f32.mrf.mxu2  ;;  %v2088_v44 = vpop.f32.mrf.mxu3 }
  0xbe   : > { %v523_v45 = vpop.f32.mrf.mxu0  ;;  %v552_v46 = vpop.f32.mrf.mxu1 }
  0xc5   : > { %v581_v47 = vpop.f32.mrf.mxu2  ;;  %v610_v48 = vpop.f32.mrf.mxu3 }
  0xc6   : > { %v526_v49 = vpop.f32.mrf.mxu0  ;;  %v555_v50 = vpop.f32.mrf.mxu1 }
  0xcd   : > { %v584_v51 = vpop.f32.mrf.mxu2  ;;  %v613_v52 = vpop.f32.mrf.mxu3 }
  0xce   : > { %v2090_v53 = vpop.f32.mrf.mxu0  ;;  %v2092_v54 = vpop.f32.mrf.mxu1 }
  0xd5   : > { %v2094_v55 = vpop.f32.mrf.mxu2  ;;  %v2096_v56 = vpop.f32.mrf.mxu3 }
  0xd6   : > { %v2098_v57 = vpop.f32.mrf.mxu0  ;;  %v2100_v58 = vpop.f32.mrf.mxu1 }
  0xdd   : > { %v2102_v59 = vpop.f32.mrf.mxu2  ;;  %v2104_v60 = vpop.f32.mrf.mxu3 }
  0xde   : > { %v2106_v61 = vpop.f32.mrf.mxu0  ;;  %v2108_v62 = vpop.f32.mrf.mxu1 }
  0xe5   : > { %v2110_v63 = vpop.f32.mrf.mxu2  ;;  %v2112_v0 = vpop.f32.mrf.mxu3 }
  0xe6   : > { %v2114_v1 = vpop.f32.mrf.mxu0  ;;  %v2116_v2 = vpop.f32.mrf.mxu1 }
  0xed   : > { %v2118_v3 = vpop.f32.mrf.mxu2  ;;  %v2120_v4 = vpop.f32.mrf.mxu3 }
  0xee   : > { %v796_v5 = vpop.f32.mrf.mxu0  ;;  %v825_v6 = vpop.f32.mrf.mxu1 }
  0xef   : > { %v797_v17 = vadd.f32 %v796_v5, %v517_v37  ;;  %v826_v18 = vadd.f32 %v825_v6, %v546_v38 }
  0xf1   : > { %v1035_v22 = vadd.f32 %v2126_v19, %v797_v17  ;;  %v1036_v26 = vadd.f32 %v2126_v19, %v826_v18 }
  0xf3   : > { %1648 = vtanh.f32 %v1035_v22 }
  0xf4   : > { %1650 = vtanh.f32 %v1036_v26 }
  0xf5   : > { %v854_v7 = vpop.f32.mrf.mxu2  ;;  %v883_v8 = vpop.f32.mrf.mxu3 }
  0xf6   : > { %v799_v9 = vpop.f32.mrf.mxu0  ;;  %v828_v10 = vpop.f32.mrf.mxu1 }
  0xf7   : > { %v800_v31 = vadd.f32 %v799_v9, %v520_v41  ;;  %v829_v32 = vadd.f32 %v828_v10, %v549_v42  ;;  %v855_v10 = vadd.f32 %v854_v7, %v2082_v39 }
  0xf9   : > { %v1043_v37 = vadd.f32 %v2122_v11, %v800_v31  ;;  %v1037_v18 = vadd.f32 %v2126_v19, %v855_v10 }
  0xfd   : > { %v857_v13 = vpop.f32.mrf.mxu2  ;;  %v886_v14 = vpop.f32.mrf.mxu3 }
  0xfe   : > { %v802_v15 = vpop.f32.mrf.mxu0  ;;  %v831_v16 = vpop.f32.mrf.mxu1 }
  0xff   : > { %v803_v23 = vadd.f32 %v802_v15, %v523_v45  ;;  %v832_v27 = vadd.f32 %v831_v16, %v552_v46  ;;  %v1044_v45 = vadd.f32 %v2122_v11, %v829_v32  ;;  %v1649_v15 = vpop.eup %1648 }
 0x101   : > { %v1051_v35 = vadd.f32 %v2130_v28, %v803_v23  ;;  %v1052_v36 = vadd.f32 %v2130_v28, %v832_v27 }
 0x105   : > { %v860_v20 = vpop.f32.mrf.mxu2  ;;  %v889_v21 = vpop.f32.mrf.mxu3 }
 0x106   : > { %v805_v24 = vpop.f32.mrf.mxu0  ;;  %v834_v25 = vpop.f32.mrf.mxu1  ;;  %v861_v38 = vadd.f32 %v860_v20, %v581_v47  ;;  %v890_v46 = vadd.f32 %v889_v21, %v610_v48  ;;  %v887_v47 = vadd.f32 %v886_v14, %v2088_v44 }
 0x107   : > { %v806_v29 = vadd.f32 %v805_v24, %v526_v49  ;;  %v835_v30 = vadd.f32 %v834_v25, %v555_v50  ;;  %v858_v49 = vadd.f32 %v857_v13, %v2086_v43 }
 0x108   : > { %v1053_v48 = vadd.f32 %v2130_v28, %v861_v38  ;;  %v1054_v13 = vadd.f32 %v2130_v28, %v890_v46  ;;  %v1046_v7 = vadd.f32 %v2122_v11, %v887_v47  ;;  %v1100_v46 = vld [vmem:[%s2276_s7] sm:$0xf] }
 0x109   : > { %v1059_v33 = vadd.f32 %v2124_v12, %v806_v29  ;;  %v1060_v34 = vadd.f32 %v2124_v12, %v835_v30  ;;  %v1045_v39 = vadd.f32 %v2122_v11, %v858_v49  ;;  %v2161_v30 = vld [vmem:[%s2275_s6] sm:$0xf]  ;;  %1103 = vperm.xlu2 %1647, %v1100_v46  }
 0x10b   : > { %1652 = vtanh.f32 %v1059_v33 }
 0x10c   : > { %1654 = vtanh.f32 %v1060_v34 }
 0x10d   : > { %v863_v41 = vpop.f32.mrf.mxu2  ;;  %v892_v42 = vpop.f32.mrf.mxu3  ;;  %1656 = vtanh.f32 %v1051_v35 }
 0x10e   : > { %v864_v50 = vadd.f32 %v863_v41, %v584_v51  ;;  %v893_v5 = vadd.f32 %v892_v42, %v613_v52  ;;  %v2139_v6 = vpop.f32.mrf.mxu0  ;;  %v2141_v9 = vpop.f32.mrf.mxu1  ;;  %1658 = vtanh.f32 %v1052_v36  ;;  %v884_v52 = vadd.f32 %v883_v8, %v2084_v40 }
 0x10f   : > { %1660 = vtanh.f32 %v1043_v37  ;;  %v1651_v51 = vpop.eup %1650  ;;  %v913_v41 = vadd.f32 %v2139_v6, %v2090_v53  ;;  %v942_v42 = vadd.f32 %v2141_v9, %v2092_v54 }
 0x110   : > { %v1061_v16 = vadd.f32 %v2124_v12, %v864_v50  ;;  %v1062_v43 = vadd.f32 %v2124_v12, %v893_v5  ;;  %1662 = vtanh.f32 %v1044_v45  ;;  %v1038_v40 = vadd.f32 %v2126_v19, %v884_v52 }
 0x111   : > { %v1653_v17 = vpop.eup %1652  ;;  %v1039_v5 = vadd.f32 %v2126_v19, %v913_v41 }
 0x112   : > { %1664 = vtanh.f32 %v1061_v16  ;;  %v1655_v44 = vpop.eup %1654  ;;  %1122 = vmatpush.msra.mxu0 %v1653_v17 }
 0x113   : > { %1666 = vtanh.f32 %v1062_v43  ;;  %v1657_v14 = vpop.eup %1656  ;;  %1142 = vmatpush.msra.mxu1 %v1655_v44 }
 0x114   : > { %1668 = vtanh.f32 %v1053_v48  ;;  %v1659_v20 = vpop.eup %1658  ;;  %1123 = vmatpush.msra.mxu0 %v1657_v14  ;;  %v1040_v48 = vadd.f32 %v2126_v19, %v942_v42 }
 0x115   : > { %1670 = vtanh.f32 %v1054_v13  ;;  %v2154_v8 = vpop.f32.mrf.mxu2  ;;  %v2156_v21 = vpop.f32.mrf.mxu3  ;;  %1143 = vmatpush.msra.mxu1 %v1659_v20 }
 0x116   : > { %v1661_v22 = vpop.eup %1660  ;;  %1672 = vtanh.f32 %v1045_v39  ;;  %v915_v23 = vpop.f32.mrf.mxu0 }
 0x117   : > { %v944_v24 = vpop.f32.mrf.mxu1  ;;  %v1663_v25 = vpop.eup %1662  ;;  %1674 = vtanh.f32 %v1046_v7  ;;  %1124 = vmatpush.msra.mxu0 %v1661_v22  ;;  %v916_v6 = vadd.f32 %v915_v23, %v2098_v57  ;;  %v971_v7 = vadd.f32 %v2154_v8, %v2094_v55 }
 0x118   : > { %v1665_v26 = vpop.eup %1664  ;;  %1676 = vtanh.f32 %v1037_v18  ;;  %1144 = vmatpush.msra.mxu1 %v1663_v25  ;;  %v945_v54 = vadd.f32 %v944_v24, %v2100_v58 }
 0x119   : > { %v1667_v27 = vpop.eup %1666  ;;  %1678 = vtanh.f32 %v1038_v40  ;;  %1125 = vmatpush.msra.mxu0 %v1649_v15  ;;  %1162 = vmatpush.msra.mxu2 %v1665_v26  ;;  %v1041_v23 = vadd.f32 %v2126_v19, %v971_v7 }
 0x11a   : > { %v1669_v29 = vpop.eup %1668  ;;  %1145 = vmatpush.msra.mxu1 %v1651_v51  ;;  %1182 = vmatpush.msra.mxu3 %v1667_v27  ;;  %1680 = vtanh.f32 %v1039_v5 }
 0x11b   : > { %v1671_v31 = vpop.eup %1670  ;;  %1163 = vmatpush.msra.mxu2 %v1669_v29  ;;  %1566 = vmatmul.msk.f32.vlgmr.msra.gmra.mxu1 %vm1106_vm2, %v2161_v30  ;;  %1682 = vtanh.f32 %v1040_v48 }
 0x11c   : > { %v1673_v32 = vpop.eup %1672  ;;  %1183 = vmatpush.msra.mxu3 %v1671_v31  ;;  %1565 = vmatmul.msk.f32.vlgmr.msra.gmra.mxu0 %vm1106_vm2, %v2161_v30 }
 0x11d   : > { %v1675_v33 = vpop.eup %1674  ;;  %v973_v34 = vpop.f32.mrf.mxu2  ;;  %1164 = vmatpush.msra.mxu2 %v1673_v32  ;;  %v1270_v32 = vld [vmem:[%s1950_s24] sm:$0xff]  ;;  %s1581_s24 = sshll.u32 %s1816_s30, 5  ;;  %s1321_s30 = scalar_lea.sflag [#allocation4], %s1946_s14 }
 0x11e   : > { %v1002_v35 = vpop.f32.mrf.mxu3  ;;  %v1677_v36 = vpop.eup %1676  ;;  %1184 = vmatpush.msra.mxu3 %v1675_v33  ;;  %v974_v17 = vadd.f32 %v973_v34, %v2102_v59  ;;  %v1273_v34 = vperm.slane %v1270_v32, 1  ;;  %v1275_v5 = vperm.slane %v1270_v32, 3  ;;  %s1334_s25 = scalar_lea.hbm %s2277_s8, %s1581_s24  ;;  %v1278_v7 = vperm.slane %v1270_v32, 6 }
 0x11f   : > { %v918_v37 = vpop.f32.mrf.mxu0  ;;  %v947_v38 = vpop.f32.mrf.mxu1  ;;  %1165 = vmatpush.msra.mxu2 %v1677_v36  ;;  %v1272_v36 = vperm.slane %v1270_v32, 0  ;;  %s1338_s17 = sshll.u32 %s1334_s25, 4  ;;  %s1339_s17 = int_to_ptr.hbm [resolvable:$true] %s1338_s17 }
 0x120   : > { %v1679_v45 = vpop.eup %1678  ;;  %1567 = vmatmul.msk.f32.vlgmr.msra.gmra.mxu2 %vm1106_vm2, %v2161_v30  ;;  %v919_v10 = vadd.f32 %v918_v37, %v2106_v61  ;;  %v948_v16 = vadd.f32 %v947_v38, %v2108_v62  ;;  %v1047_v62 = vadd.f32 %v2122_v11, %v916_v6  ;;  %v1049_v55 = vadd.f32 %v2122_v11, %v974_v17  ;;  %s1756_s11 = sshra.s32 %s1339_s17, 4  ;;  %s1757_s11 = int_to_ptr.hbm [resolvable:$true] %s1756_s11 }
 0x121   : > { %1185 = vmatpush.msra.mxu3 %v1679_v45  ;;  %v1681_v14 = vpop.eup %1680  ;;  %v1277_v6 = vperm.slane %v1270_v32, 5  ;;  %s1758_s16 = scalar_lea.hbm %s1757_s11, 32  ;;  %p1763_p8 = scmp.lt.s32.totalorder %s1757_s11, %s2277_s8 }
 0x122   : > { %1568 = vmatmul.msk.f32.vlgmr.msra.gmra.mxu3 %vm1106_vm2, %v2161_v30  ;;  %v1055_v61 = vadd.f32 %v2130_v28, %v919_v10  ;;  %v1056_v52 = vadd.f32 %v2130_v28, %v948_v16  ;;  %v1683_v59 = vpop.eup %1682  ;;  %p1759_p5 = scmp.ne.s32.totalorder %s1757_s11, %s1758_s16  ;;  %p1764_p10 = scmp.lt.s32.totalorder %s1762_s23, %s1758_s16 }
 0x124   : > { %p1760_p6 = pnand %p1759_p5, %p1923_p9  ;;  %p1765_p13 = por %p1764_p10, %p1763_p8 }
 0x125   : > { %v976_v49 = vpop.f32.mrf.mxu2 }
 0x126   : > { %v1005_v50 = vpop.f32.mrf.mxu3  ;;  %p1761_p7 = pneg %p1760_p6 }
 0x127   : > { %v921_v47 = vpop.f32.mrf.mxu0  ;;  %v950_v15 = vpop.f32.mrf.mxu1  ;;  %v1006_v57 = vadd.f32 %v1005_v50, %v2112_v0  ;;  %v1274_v50 = vperm.slane %v1270_v32, 2 }
 0x128   : > { %v922_v43 = vadd.f32 %v921_v47, %v2114_v1  ;;  %v951_v53 = vadd.f32 %v950_v15, %v2116_v2  ;;  %v977_v1 = vadd.f32 %v976_v49, %v2110_v63  ;;  %v1048_v2 = vadd.f32 %v2122_v11, %v945_v54  ;;  %p1766_p0 = pnand %p1765_p13, %p1761_p7 }
 0x129   : > { %v1003_v63 = vadd.f32 %v1002_v35, %v2104_v60 }
 0x12a   : > { %v1063_v9 = vadd.f32 %v2124_v12, %v922_v43  ;;  %v1064_v51 = vadd.f32 %v2124_v12, %v951_v53  ;;  %v1057_v0 = vadd.f32 %v2130_v28, %v977_v1 }
 0x12b   : > { %v1050_v8 = vadd.f32 %v2122_v11, %v1003_v63 }
 0x12c   : > { %1684 = vtanh.f32 %v1063_v9  ;;  %v1276_v9 = vperm.slane %v1270_v32, 4 }
 0x12d   : > { %1686 = vtanh.f32 %v1064_v51  ;;  %v979_v58 = vpop.f32.mrf.mxu2 }
 0x12e   : > { %v1008_v13 = vpop.f32.mrf.mxu3  ;;  %1688 = vtanh.f32 %v1055_v61  ;;  %v980_v39 = vadd.f32 %v979_v58, %v2118_v3  ;;  %v1000_v3 = vadd.f32 %v2156_v21, %v2096_v56  ;;  %v1279_v58 = vperm.slane %v1270_v32, 7 }
 0x12f   : > { %v1009_v44 = vadd.f32 %v1008_v13, %v2120_v4  ;;  %1690 = vtanh.f32 %v1056_v52  ;;  %v1058_v4 = vadd.f32 %v2130_v28, %v1006_v57 }
 0x130   : > { %1692 = vtanh.f32 %v1047_v62  ;;  %v1065_v18 = vadd.f32 %v2124_v12, %v980_v39  ;;  %v1042_v56 = vadd.f32 %v2126_v19, %v1000_v3 }
 0x131   : > { %v1066_v20 = vadd.f32 %v2124_v12, %v1009_v44  ;;  %1694 = vtanh.f32 %v1048_v2 }
 0x132   : > { %v1685_v40 = vpop.eup %1684  ;;  %1696 = vtanh.f32 %v1065_v18 }
 0x133   : > { %v1687_v60 = vpop.eup %1686  ;;  %1698 = vtanh.f32 %v1066_v20  ;;  %1202 = vmatpush.msrb.mxu0 %v1685_v40 }
 0x134   : > { %v1689_v22 = vpop.eup %1688  ;;  %1700 = vtanh.f32 %v1057_v0  ;;  %1222 = vmatpush.msrb.mxu1 %v1687_v60 }
 0x135   : > { %v1691_v12 = vpop.eup %1690  ;;  %1702 = vtanh.f32 %v1058_v4  ;;  %1203 = vmatpush.msrb.mxu0 %v1689_v22 }
 0x136   : > { %v1693_v28 = vpop.eup %1692  ;;  %1704 = vtanh.f32 %v1049_v55  ;;  %1223 = vmatpush.msrb.mxu1 %v1691_v12 }
 0x137   : > { %v1695_v21 = vpop.eup %1694  ;;  %1706 = vtanh.f32 %v1050_v8  ;;  %1204 = vmatpush.msrb.mxu0 %v1693_v28 }
 0x138   : > { %v1697_v24 = vpop.eup %1696  ;;  %1708 = vtanh.f32 %v1041_v23  ;;  %1224 = vmatpush.msrb.mxu1 %v1695_v21 }
 0x139   : > { %v1699_v11 = vpop.eup %1698  ;;  %1710 = vtanh.f32 %v1042_v56  ;;  %1205 = vmatpush.msrb.mxu0 %v1681_v14  ;;  %1242 = vmatpush.msrb.mxu2 %v1697_v24 }
 0x13a   : > { %v1701_v25 = vpop.eup %1700  ;;  %1225 = vmatpush.msrb.mxu1 %v1683_v59  ;;  %1262 = vmatpush.msrb.mxu3 %v1699_v11 }
 0x13b   : > { %v1703_v19 = vpop.eup %1702  ;;  %1243 = vmatpush.msrb.mxu2 %v1701_v25  ;;  %1570 = vmatmul.msk.f32.vlgmr.msrb.gmra.mxu1 %vm1106_vm2, %v2161_v30 }
 0x13c   : > { %v1705_v26 = vpop.eup %1704  ;;  %1263 = vmatpush.msrb.mxu3 %v1703_v19  ;;  %1569 = vmatmul.msk.f32.vlgmr.msrb.gmra.mxu0 %vm1106_vm2, %v2161_v30 }
 0x13d   : > { %v1707_v27 = vpop.eup %1706  ;;  %1244 = vmatpush.msrb.mxu2 %v1705_v26 }
 0x13e   : > { %v1709_v29 = vpop.eup %1708  ;;  %1264 = vmatpush.msrb.mxu3 %v1707_v27 }
 0x13f   : > { %v1711_v31 = vpop.eup %1710  ;;  %1245 = vmatpush.msrb.mxu2 %v1709_v29 }
 0x140   : > { %1265 = vmatpush.msrb.mxu3 %v1711_v31  ;;  %1571 = vmatmul.msk.f32.vlgmr.msrb.gmra.mxu2 %vm1106_vm2, %v2161_v30 }
 0x141   : > { %1572 = vmatmul.msk.f32.vlgmr.msrb.gmra.mxu3 %vm1106_vm2, %v2161_v30 }
 0x163   : > { %v1104_v33 = vpop.permute.xlu2 %1103 }
 0x198   : > { %v1147_v35 = vpop.f32.mrf.mxu1 }
 0x199   : > { %v1127_v37 = vpop.f32.mrf.mxu0  ;;  %v1148_v38 = vadd.f32 %v1147_v35, %v1104_v33 }
 0x19a   : > { %v1128_v45 = vadd.f32 %v1127_v37, %v1104_v33 }
 0x19b   : > { %v1289_v46 = vmul.f32 %v1273_v34, %v1148_v38 }
 0x19c   : > { %v1288_v41 = vmul.f32 %v1272_v36, %v1128_v45 }
 0x19d   : > { %v1304_v42 = vrot.slane %v1289_v46, 4 }
 0x19f   : > { %v1308_v49 = vsel %vm483_vm0, %v1288_v41, %v1304_v42 }
 0x1a0   : > { %1316 = vst [vmem:[%s2221_s22] sm:$0xff] %v1308_v49 }
 0x1a3   : > { %v1167_v30 = vpop.f32.mrf.mxu2 }
 0x1a4   : > { %v1168_v47 = vadd.f32 %v1167_v30, %v1104_v33 }
 0x1a5   : > { %v1187_v10 = vpop.f32.mrf.mxu3 }
 0x1a6   : > { %v1188_v15 = vadd.f32 %v1187_v10, %v1104_v33  ;;  %v1290_v48 = vmul.f32 %v1274_v50, %v1168_v47 }
 0x1a8   : > { %v1291_v16 = vmul.f32 %v1275_v5, %v1188_v15 }
 0x1aa   : > { %v1305_v43 = vrot.slane %v1291_v16, 4 }
 0x1ac   : > { %v1309_v53 = vsel %vm483_vm0, %v1290_v48, %v1305_v43 }
 0x1ad   : > { %1317 = vst [vmem:[%s2221_s22 + $0x8] sm:$0xff] %v1309_v53 }
 0x1b8   : > { %v1227_v54 = vpop.f32.mrf.mxu1 }
 0x1b9   : > { %v1228_v51 = vadd.f32 %v1227_v54, %v1104_v33  ;;  %v1207_v61 = vpop.f32.mrf.mxu0 }
 0x1ba   : > { %v1208_v52 = vadd.f32 %v1207_v61, %v1104_v33 }
 0x1bb   : > { %v1293_v62 = vmul.f32 %v1277_v6, %v1228_v51 }
 0x1bc   : > { %v1292_v1 = vmul.f32 %v1276_v9, %v1208_v52 }
 0x1bd   : > { %v1306_v2 = vrot.slane %v1293_v62, 4 }
 0x1bf   : > { %v1310_v57 = vsel %vm483_vm0, %v1292_v1, %v1306_v2 }
 0x1c0   : > { %1318 = vst [vmem:[%s2221_s22 + $0x10] sm:$0xff] %v1310_v57 }
 0x1c3   : > { %v1247_v13 = vpop.f32.mrf.mxu2 }
 0x1c4   : > { %v1267_v17 = vpop.f32.mrf.mxu3  ;;  %v1248_v44 = vadd.f32 %v1247_v13, %v1104_v33 }
 0x1c5   : > { %v1268_v39 = vadd.f32 %v1267_v17, %v1104_v33 }
 0x1c6   : > { %v1294_v0 = vmul.f32 %v1278_v7, %v1248_v44 }
 0x1c7   : > { %v1295_v63 = vmul.f32 %v1279_v58, %v1268_v39 }
 0x1c9   : > { %v1307_v14 = vrot.slane %v1295_v63, 4 }
 0x1cb   : > { %v1311_v18 = vsel %vm483_vm0, %v1294_v0, %v1307_v14 }
 0x1cc   : > { %1319 = vst [vmem:[%s2221_s22 + $0x18] sm:$0xff] %v1311_v18 }
 0x1cd   : > { %1769 = shalt.err (!%p1766_p0)
}
 0x1ce   : > { %1584 = dma.vmem_to_hbm [thread:$0]  (%p1923_p9), %s1337_s26, 512, %s1339_s17, %s1321_s30  }
 0x1cf PF: > { %s1350_s14 = sand.u32 1, %s1804_s27   ;;  %p1591_p1 = pnand %p1473_p12, %p1930_p11 }
 0x1d0   : > { %s1351_s22 = scalar_lea.sflag [#allocation4], %s1350_s14 }
 0x1d1   : > { %p1592_p2 = pneg %p1591_p1 }
 0x1d3   : > { %1799 = dma.done.wait (%p1592_p2), %s1351_s22, 512  }
 0x1d4   : > { %1801 = vsyncadd (%p1592_p2), %s1351_s22, 4294966784  ;;  %s24_s10 = sadd.s32 1, %s1824_s10   ;;  %s2284_s18 = sld [smem:[#allocation8_spill]] }
 0x1d5   : > { %p21_p3 = scmp.ge.s32.totalorder %s24_s10, 4   ;;  %s2285_s27 = smov %s1808_s28 }
 0x1d6   : > { %s2286_s28 = smov %s1812_s29  ;;  %s2287_s29 = smov %s1928_s19 }
 0x1d7   : > { %s2288_s30 = smov %s1820_s9  ;;  %23 = sbr.rel (!%p21_p3) target bundleno = 6 (0x6), region = 112 }
 0x1da   : > { %s2289_s9 = smov %s2284_s18 }
 0x1dc   :  { %1357 = vsyncpa [#allocation3], 1 }
 0x1dd   :  { %1359 = vsyncpa [#allocation3 + $0x1], 1 }
 0x1de   :  { %1360 = vsyncpa [#allocation4], 1 }
 0x1df   :  { %1362 = vsyncpa [#allocation4 + $0x1], 1 }

</bundles_post_ra>
